<compile_context>
chip_gen: v7x
topology: tpu7x:2x2x1
jax: 0.10.0
libtpu: 0.0.40
codegen_flags: <defaults>
</compile_context>

<pallas_src>
from functools import partial

import numpy as np
import jax
import jax.numpy as jnp
from jax.experimental import pallas as pl
from jax.experimental.pallas import tpu as pltpu


def _stu_last_step_kernel(x_ref, w_ref, b_ref, out_ref, *, C):
    """Fused conv1d(fixed filters) + Linear, evaluated at the last time step only.

    x_ref   : (TB, 1, T_blk)  VMEM  tail block of the input rows (time on lanes)
    w_ref   : (C, T_blk)      VMEM  fused effective weights, zero-extended to T_blk
    b_ref   : (C,)            SMEM  Linear bias scalars
    out_ref : (TB, C)         VMEM  last-step STU output
    """
    x_blk = x_ref[:, 0, :].astype(jnp.float32)                  # (TB, T_blk)
    cols = []
    for c in range(C):
        w_row = w_ref[pl.ds(c, 1), :].astype(jnp.float32)       # (1, T_blk)
        # dense VPU multiply + XLU lane reduce; only the last L_eff lanes of
        # w_row are nonzero, so this IS the last-step tap sum.
        cols.append(jnp.sum(x_blk * w_row, axis=-1, keepdims=True) + b_ref[c])
    out = cols[0] if C == 1 else jnp.concatenate(cols, axis=1)  # (TB, C)
    out_ref[...] = out.astype(out_ref.dtype)


def stu_predictor_forward(x, fixed_filters, proj_w_t, proj_b):
    """STUPredictor.forward.

    x            : (B, 1, T)  (NCL, in_channels == 1)
    fixed_filters: (F, L)     fixed conv1d filters (out_channels=F, in_channels=1)
    proj_w_t     : (F, C)     torch Linear weight, transposed
    proj_b       : (C,)       torch Linear bias
    returns      : (B, C)     == stu_layer(x)[:, -1, :]
    """
    B, Cin, T = x.shape
    assert Cin == 1, "STULayer's conv1d has in_channels == 1"
    F_, L = fixed_filters.shape
    assert proj_w_t.shape[0] == F_
    C = proj_w_t.shape[1]

    pad = L // 2
    L_eff = L - pad  # taps of the last conv output that land on real (unpadded) x
    assert T >= L_eff, "sequence shorter than the filter's causal extent"

    # Fused effective weights for the LAST time step only (tiny, constant-foldable):
    #   stu_out[b, -1, c] = sum_{l<L_eff} x[b, 0, T-L_eff+l] * W_eff[l, c] + bias[c]
    # with W_eff[l, c] = sum_f filters[f, l] * W[c, f].
    w_tail = (proj_w_t.T.astype(jnp.float32)
              @ fixed_filters.astype(jnp.float32)[:, :L_eff])       # (C, L_eff)
    bias = proj_b.astype(jnp.float32).reshape(C)

    # Only a lane-aligned tail block of x is needed by the last time step.
    if T >= 128 and T % 128 == 0 and L_eff <= 128:
        T_blk, blk_t = 128, T // 128 - 1
    else:
        T_blk, blk_t = T, 0
    # Zero-extend the fused weights to the block width: the kernel then does one
    # aligned full-width multiply + lane reduce (no offset slices / masked loads).
    w_blk = jnp.zeros((C, T_blk), jnp.float32).at[:, T_blk - L_eff:].set(w_tail)

    # Batch blocking: B maps to sublanes, time to lanes.  Whole batch in one
    # program at small B; for huge B the grid splits batch blocks ("parallel" so
    # v7x's two TensorCores shard them; harmless on single-TC v5e/v6e).  VMEM use
    # is ~TB*T_blk*4 B, far under every generation's limit, so no
    # vmem_limit_bytes override is needed.
    TB = min(B, 1024)
    grid = (pl.cdiv(B, TB),)

    kernel = partial(_stu_last_step_kernel, C=C)

    out = pl.pallas_call(
        kernel,
        out_shape=jax.ShapeDtypeStruct((B, C), jnp.float32),
        grid=grid,
        in_specs=[
            pl.BlockSpec((TB, 1, T_blk), lambda i: (i, 0, blk_t)),   # x tail block
            pl.BlockSpec((C, T_blk), lambda i: (0, 0)),              # fused weights
            pl.BlockSpec(memory_space=pltpu.MemorySpace.SMEM),       # bias scalars
        ],
        out_specs=pl.BlockSpec((TB, C), lambda i: (i, 0)),
        compiler_params=pltpu.CompilerParams(
            dimension_semantics=("parallel",)),
    )(x, w_blk, bias)
    return out


if __name__ == "__main__":
    key = jax.random.PRNGKey(0)
    k_f, k_w, k_b, k_x = jax.random.split(key, 4)

    # Small shapes consistent with the module's forward.
    B, T = 2, 16
    num_filters, L = 8, 9          # fixed_filters.shape
    out_channels = 1               # STULayer's Linear output width

    # Deterministic synthetic "parameters".
    fixed_filters = jax.random.normal(k_f, (num_filters, L), jnp.float32)
    # nn.Linear(num_filters, out_channels): weight (C, F), bias (C,)
    lin_w = jax.random.normal(k_w, (out_channels, num_filters), jnp.float32) * 0.1
    lin_b = jax.random.normal(k_b, (out_channels,), jnp.float32) * 0.1
    x = jax.random.normal(k_x, (B, 1, T), jnp.float32)

    out = stu_predictor_forward(x, fixed_filters, lin_w.T, lin_b)
    out = jax.block_until_ready(out)

    # Pure-JAX reference with the original (unfused, full-sequence) semantics:
    # F.conv1d(padding=L//2) + transpose + Linear, then [:, -1, :].
    pad = L // 2
    T_out = T + 2 * pad - L + 1
    xpad = jnp.pad(x[:, 0, :], ((0, 0), (pad, pad)))
    conv_ref = jnp.stack(
        [sum(xpad[:, l:l + T_out] * fixed_filters[f, l] for l in range(L))
         for f in range(num_filters)],
        axis=-1)                                   # (B, T_out, F)
    stu_ref = conv_ref @ lin_w.T + lin_b           # (B, T_out, C)
    ref = stu_ref[:, -1, :]                        # (B, C)

    assert out.shape == (B, out_channels), out.shape
    assert np.allclose(np.asarray(out), np.asarray(ref), atol=1e-4, rtol=1e-4)
    print("KERNEL_OK")
</pallas_src>

<mosaic_0001>
module attributes {stable_mosaic.version = 11 : i64} {
  func.func @_stu_last_step_kernel(%arg0: i32, %arg1: memref<2x1x16xf32, #tpu.memory_space<vmem>>, %arg2: memref<1x16xf32, #tpu.memory_space<vmem>>, %arg3: memref<1xf32, #tpu.memory_space<smem>>, %arg4: memref<2x1xf32, #tpu.memory_space<vmem>>) attributes {dimension_semantics = [#tpu.dimension_semantics<parallel>], iteration_bounds = array<i64: 1>, scalar_prefetch = 0 : i64, scratch_operands = 0 : i64, tpu.core_type = #tpu.core_type<tc>, window_params = [{transform_indices = @transform_0, window_bounds = array<i64: 2, 1, 16>}, {pipeline_mode = #tpu.pipeline_mode<synchronous>, transform_indices = @transform_1, window_bounds = array<i64: 1, 16>}, {transform_indices = @transform_2, window_bounds = array<i64: 1>}, {transform_indices = @transform_3, window_bounds = array<i64: 2, 1>}]} {
    %c0 = arith.constant 0 : index
    %c0_0 = arith.constant 0 : index
    %c0_1 = arith.constant 0 : index
    %0 = vector.load %arg1[%c0, %c0_0, %c0_1] : memref<2x1x16xf32, #tpu.memory_space<vmem>>, vector<2x1x16xf32>
    %1 = vector.shape_cast %0 : vector<2x1x16xf32> to vector<2x16xf32>
    %c0_2 = arith.constant 0 : index
    %c0_3 = arith.constant 0 : index
    %2 = vector.load %arg2[%c0_2, %c0_3] : memref<1x16xf32, #tpu.memory_space<vmem>>, vector<1x16xf32>
    %3 = vector.broadcast %2 : vector<1x16xf32> to vector<2x16xf32>
    %4 = arith.mulf %1, %3 : vector<2x16xf32>
    %cst = arith.constant dense<0.000000e+00> : vector<2xf32>
    %5 = vector.multi_reduction <add>, %4, %cst [1] : vector<2x16xf32> to vector<2xf32>
    %6 = vector.shape_cast %5 : vector<2xf32> to vector<2x1xf32>
    %c0_4 = arith.constant 0 : index
    %7 = memref.load %arg3[%c0_4] : memref<1xf32, #tpu.memory_space<smem>>
    %8 = vector.broadcast %7 : f32 to vector<2x1xf32>
    %9 = arith.addf %6, %8 : vector<2x1xf32>
    %c0_5 = arith.constant 0 : index
    %c0_6 = arith.constant 0 : index
    %10 = vector.load %arg4[%c0_5, %c0_6] : memref<2x1xf32, #tpu.memory_space<vmem>>, vector<2x1xf32>
    tpu.vector_store %arg4[%c0_5, %c0_6], %9 {strides = array<i32>} : memref<2x1xf32, #tpu.memory_space<vmem>>, vector<2x1xf32>,
    return
  }
  func.func @transform_0(%arg0: i32) -> (i32, i32, i32) {
    %c0_i32 = arith.constant 0 : i32
    %c0_i32_0 = arith.constant 0 : i32
    %c0_i32_1 = arith.constant 0 : i32
    return %arg0, %c0_i32, %c0_i32_0 : i32, i32, i32
  }
  func.func @transform_1(%arg0: i32) -> (i32, i32) {
    %c0_i32 = arith.constant 0 : i32
    %c0_i32_0 = arith.constant 0 : i32
    %c0_i32_1 = arith.constant 0 : i32
    return %c0_i32, %c0_i32_0 : i32, i32
  }
  func.func @transform_2(%arg0: i32) -> i32 {
    %c0_i32 = arith.constant 0 : i32
    %c0_i32_0 = arith.constant 0 : i32
    return %c0_i32 : i32
  }
  func.func @transform_3(%arg0: i32) -> (i32, i32) {
    %c0_i32 = arith.constant 0 : i32
    %c0_i32_0 = arith.constant 0 : i32
    return %arg0, %c0_i32 : i32, i32
  }
}

</mosaic_0001>

<bundles_post_ra>
// kernel: tpu_custom_call.1
= control target key start
LH: loop header
LB: loop body
LE: loop exit
PB: predicated region body
PF: predicated region fallthrough
CT: control target
= control target key end

     0   :  { %v26_v0 = vlaneseq  ;;  %v82_v1 = vmov 1966171168   ;;  %vm67_vm0 = vcmask 123904   ;;  %vm74_vm1 = vcmask 1024   ;;  %s118_s1 = inlined_call_operand.vmem [shape: f32[1,16], index: 1, kind: input, shape index: {}]   ;;  %s119_s0 = inlined_call_operand.vmem [shape: f32[2,1,16], index: 0, kind: input, shape index: {}]   ;;  %s120_s2 = inlined_call_operand.<no memory space> [shape: f32[1], index: 2, kind: input, shape index: {}]   ;;  %s121_s3 = inlined_call_operand.vmem [shape: f32[2,1], index: 3, kind: output, shape index: {}]  }
   0x1   :  { %v24_v2 = vunpack.c.l.s4 %v82_v1  ;;  %v80_v5 = vld [vmem:[%s118_s1] ss:$0 sm:$0xff]  ;;  %v16_v11 = vld [vmem:[%s119_s0 + $0x1] sm:$0x1]  ;;  %v72_v19 = vstv %s120_s2 }
   0x2   :  { %v27_v3 = vshrl.u32 %v26_v0, 7  ;;  %v15_v8 = vld [vmem:[%s119_s0] sm:$0x1] }
   0x3   :  { %v25_v4 = vunpack.c.0.s8 %v24_v2 }
   0x5   :  { %v28_v6 = vsub.s32 %v25_v4, %v27_v3 }
   0x7   :  { %v29_v7 = vrot.slane %v80_v5, %v28_v6 }
   0x9   :  { %v30_v9 = vcombine.high %v29_v7, %v29_v7  ;;  %v37_v10 = vrot.slane %v29_v7, %v28_v6 }
   0xb   :  { %v44_v12 = vrot.slane %v30_v9, %v28_v6  ;;  %v47_v13 = vmul.f32 %v37_v10, %v15_v8 }
   0xd   :  { %v48_v14 = vmul.f32 %v44_v12, %v16_v11 }
   0xf   :  { %v51_v15 = vcombine.low %v47_v13, %v48_v14 }
  0x11   :  { %v58_v16 = vrot.slane %v51_v15, %v28_v6 }
  0x13   :  { %v65_v17 = vrot.slane %v58_v16, %v28_v6 }
  0x15   :  { %v68_v18 = vsel %vm67_vm0, %v65_v17, 0.0 }
  0x16   :  { %69 = vadd.xlane.f32.xlu0 %v68_v18 }
  0xa3   :  { %v70_v20 = vpop.xlane.xlu0 %69 }
  0xa4   :  { %v73_v21 = vadd.f32 %v72_v19, %v70_v20 }
  0xa6   :  { %75 = vst.msk [vmem:[%s121_s3] sm:$0x3] %vm74_vm1, %v73_v21 }

</bundles_post_ra>
